<compile_context>
chip_gen: v5e
topology: v5e:2x2
jax: 0.10.0
libtpu: 0.0.40
codegen_flags: <defaults>
</compile_context>

<pallas_src>
import functools

import jax
import jax.numpy as jnp
import numpy as np
from jax.experimental import pallas as pl
from jax.experimental.pallas import tpu as pltpu


def _round_up(x, m):
    return ((x + m - 1) // m) * m


def _cdiv(a, b):
    return -(-a // b)


def _silu(v):
    """SiLU(v) = v * sigmoid(v); sigmoid via a single EUP tanh."""
    return v * (0.5 * jnp.tanh(0.5 * v) + 0.5)


# ------------------------------ Pallas kernel ------------------------------ #

def _bottleneck_kernel(xw_ref, w1_ref, b1_ref, mask_ref, w2_ref, b2_ref,
                       out_ref, y_ref, *, Wp, Lt, LYt, LXw, add_residual):
    """One (image, row-tile) step: cv2(cv1(x)) (+ x), channels on sublanes.

    xw_ref  : (1, 1, C1p, LW)  bf16 row-aligned padded-input window; lane m is
              padded-image flat index (tile_row0 - 2 + m//Wp, m%Wp).
    w*_ref  : (3, Coutp, 3*Cinp) BN-folded weights, [ky][o, kx*Cinp + i].
    b*_ref  : (Coutp, 1) folded BN bias (f32).
    mask_ref: (1, 1, LYt) bf16, 1 where the cv1-activation position is valid.
    out_ref : (1, C2p, Lt) bf16; valid outputs at local flat index r*Wp + c.
    y_ref   : VMEM scratch (C_p, LYt) bf16 holding the masked cv1 activation.
    """
    f32 = jnp.float32

    # ---- cv1: stack the 3 kx-shifted input windows along sublanes ----------
    base = Wp - 1
    x3 = jnp.concatenate(
        [xw_ref[0, 0, :, base + kx:base + kx + LXw] for kx in range(3)],
        axis=0)                                        # (3*C1p, LXw) bf16

    # 3 dots with K = 3*C1p; chained accumulation (MRB-friendly on v7x).
    acc1 = jnp.dot(w1_ref[0], x3[:, 0:LYt], preferred_element_type=f32)
    acc1 = acc1 + jnp.dot(w1_ref[1], x3[:, Wp:Wp + LYt],
                          preferred_element_type=f32)
    acc1 = acc1 + jnp.dot(w1_ref[2], x3[:, 2 * Wp:2 * Wp + LYt],
                          preferred_element_type=f32)
    y1 = _silu(acc1 + b1_ref[...])

    # Zero every invalid flat position: this *is* cv2's zero padding.
    y_ref[...] = (y1 * mask_ref[0]).astype(y_ref.dtype)

    # ---- cv2 on the VMEM-resident cv1 activation ----------------------------
    LYw = Lt + 2 * Wp
    y3 = jnp.concatenate(
        [y_ref[:, kx:kx + LYw] for kx in range(3)], axis=0)   # (3*C_p, LYw)
    acc2 = jnp.dot(w2_ref[0], y3[:, 0:Lt], preferred_element_type=f32)
    acc2 = acc2 + jnp.dot(w2_ref[1], y3[:, Wp:Wp + Lt],
                          preferred_element_type=f32)
    acc2 = acc2 + jnp.dot(w2_ref[2], y3[:, 2 * Wp:2 * Wp + Lt],
                          preferred_element_type=f32)
    y2 = _silu(acc2 + b2_ref[...])

    if add_residual:
        # x[r, c] sits at window lane (q + 3*Wp + 1) for output local flat q.
        y2 = y2 + xw_ref[0, 0, :, 3 * Wp + 1:3 * Wp + 1 + Lt].astype(f32)

    out_ref[0] = y2.astype(out_ref.dtype)


# ------------------------------ JAX wrappers -------------------------------- #

def _fold_bn_taps(w_oihw, gamma, beta, mean, var, eps, cout_p, cin_p, dtype):
    """Fold eval-mode BN into the conv; return kx-folded taps + bias.

    Returns ((3, cout_p, 3*cin_p) weights with layout [ky][o, kx*cin_p + i],
             (cout_p, 1) f32 bias).  Channels are zero-padded to multiples of 8
    so every sublane-dim op in the kernel is tile-aligned.
    """
    cout, cin = w_oihw.shape[0], w_oihw.shape[1]
    scale = gamma / jnp.sqrt(var + eps)
    bias = (beta - mean * scale).astype(jnp.float32)
    w = w_oihw * scale[:, None, None, None]
    w = jnp.pad(w, ((0, cout_p - cout), (0, cin_p - cin), (0, 0), (0, 0)))
    bias = jnp.pad(bias, (0, cout_p - cout)).reshape(cout_p, 1)
    # (O, I, ky, kx) -> (ky, O, kx, I) -> (3, O, 3*I)
    w_taps = jnp.transpose(w, (2, 0, 3, 1)).reshape(3, cout_p, 3 * cin_p)
    return w_taps.astype(dtype), bias


def _pick_vmem_limit_bytes():
    cap = 64 * 1024 * 1024                 # conservative fallback (v7x-sized)
    try:
        cap = int(pltpu.get_tpu_info().vmem_capacity_bytes)
    except Exception:
        pass
    # ~96 MiB on v5e/v6e (128 MiB physical), ~48 MiB on v7x (64 MiB physical).
    return max(32 * 1024 * 1024, min(3 * cap // 4, 96 * 1024 * 1024))


def _tile_geometry(TR, Wp):
    Lt = _round_up(TR * Wp, 128)            # output lane extent per tile
    LYt = _round_up(Lt + 2 * Wp + 2, 128)   # cv1-activation lane extent
    LXw = _round_up(LYt + 2 * Wp, 128)      # stacked-input lane extent
    WROWS = _cdiv(Wp + LXw + 1, Wp)         # padded-input rows per window
    return Lt, LYt, LXw, WROWS


def _choose_row_tile(N, H, Wp, C1p, C_p, C2p, budget, target_lanes=4096):
    """Pick rows-per-tile: lane-dense (>=512 lanes when possible), VMEM-safe."""
    def step_bytes(TR):
        Lt, LYt, LXw, WROWS = _tile_geometry(TR, Wp)
        b = 2 * C1p * WROWS * Wp * 2        # input window block (x2 bufs, bf16)
        b += 2 * C2p * Lt * 2               # output block (x2 bufs, bf16)
        b += C_p * LYt * 2                  # y scratch (bf16)
        b += 3 * C1p * LXw * 2              # stacked X3 value (bf16)
        b += C_p * LYt * 4                  # acc1 / y1 (f32)
        b += 3 * C_p * (Lt + 2 * Wp) * 2    # stacked Y3 value (bf16)
        b += 2 * C2p * Lt * 4               # acc2 / y2 / residual temp (f32)
        return b

    fixed = 4 * (3 * C_p * 3 * C1p + 3 * C2p * 3 * C_p)   # weights, x2 bufs
    fixed += 6 * 1024 * 1024                               # Mosaic headroom

    TR = max(1, min(H, _cdiv(target_lanes, Wp)))
    while TR > 1 and fixed + step_bytes(TR) > budget:
        TR = max(1, (TR + 1) // 2)
    T = _cdiv(H, TR)
    if N * T < 2 and H > 1:                 # give both v7x cores work at N=1
        T = 2
    return _cdiv(H, T)                      # balance the tiles


def bottleneck_forward(x_nchw, params, shortcut=True,
                       compute_dtype=jnp.bfloat16, out_dtype=jnp.bfloat16,
                       eps=1e-5):
    """Bottleneck.forward: x + cv2(cv1(x)) if (shortcut and c1 == c2)."""
    N, C1, H, W = x_nchw.shape
    C_ = params["w1"].shape[0]
    C2 = params["w2"].shape[0]
    add = bool(shortcut and C1 == C2)

    # Channel dims zero-padded to sublane multiples (free for real YOLO widths).
    C1p, C_p, C2p = (_round_up(c, 8) for c in (C1, C_, C2))

    Wp = W + 2
    vmem_limit = _pick_vmem_limit_bytes()
    TR = _choose_row_tile(N, H, Wp, C1p, C_p, C2p, budget=(vmem_limit * 7) // 10)
    Lt, LYt, LXw, WROWS = _tile_geometry(TR, Wp)
    T = _cdiv(H, TR)
    LW = WROWS * Wp

    # BN folded into bf16 weights (kx-folded tap layout) + f32 bias.
    w1_taps, b1 = _fold_bn_taps(params["w1"], params["g1"], params["b1"],
                                params["m1"], params["v1"], eps, C_p, C1p,
                                compute_dtype)
    w2_taps, b2 = _fold_bn_taps(params["w2"], params["g2"], params["b2"],
                                params["m2"], params["v2"], eps, C2p, C_p,
                                compute_dtype)

    # Single fused cast+pad: channel pad, 1px 'same' spatial pad, 2 extra zero
    # rows on top (so every in-kernel tap offset is >= 0) and enough zero rows
    # at the bottom for the last row tile.
    rows_needed = (T - 1) * TR + WROWS
    extra_bottom = max(0, rows_needed - (H + 4))
    xpad = jnp.pad(x_nchw.astype(compute_dtype),
                   ((0, 0), (0, C1p - C1), (3, 1 + extra_bottom), (1, 1)))
    xflat = xpad.reshape(N, C1p, (H + 4 + extra_bottom) * Wp)

    # Row-aligned per-tile windows -> every in-kernel lane slice is static.
    xwin = jnp.stack([xflat[:, :, t * TR * Wp: t * TR * Wp + LW]
                      for t in range(T)], axis=1)      # (N, T, C1p, LW)

    # Per-tile validity mask over the cv1-activation flat coordinate (bf16).
    p = np.arange(LYt)
    u = np.arange(T)[:, None] * (TR * Wp) + p[None, :]
    pr, pc = u // Wp, u % Wp
    mask_np = ((pr >= 1) & (pr <= H) & (pc >= 1) & (pc <= W)).astype(np.float32)
    mask = jnp.asarray(mask_np, dtype=compute_dtype).reshape(T, 1, LYt)

    kernel = functools.partial(_bottleneck_kernel, Wp=Wp, Lt=Lt, LYt=LYt,
                               LXw=LXw, add_residual=add)
    out_flat = pl.pallas_call(
        kernel,
        out_shape=jax.ShapeDtypeStruct((N, C2p, T * Lt), out_dtype),
        grid=(N, T),
        in_specs=[
            pl.BlockSpec((1, 1, C1p, LW), lambda n, t: (n, t, 0, 0)),
            pl.BlockSpec((3, C_p, 3 * C1p), lambda n, t: (0, 0, 0)),
            pl.BlockSpec((C_p, 1), lambda n, t: (0, 0)),
            pl.BlockSpec((1, 1, LYt), lambda n, t: (t, 0, 0)),
            pl.BlockSpec((3, C2p, 3 * C_p), lambda n, t: (0, 0, 0)),
            pl.BlockSpec((C2p, 1), lambda n, t: (0, 0)),
        ],
        out_specs=pl.BlockSpec((1, C2p, Lt), lambda n, t: (n, 0, t)),
        scratch_shapes=[pltpu.VMEM((C_p, LYt), compute_dtype)],
        compiler_params=pltpu.CompilerParams(
            dimension_semantics=("parallel", "parallel"),
            vmem_limit_bytes=vmem_limit),
    )(xwin, w1_taps, b1, mask, w2_taps, b2)

    # Valid outputs live at local flat index r*Wp + c inside each row tile.
    out = (out_flat.reshape(N, C2p, T, Lt)[:, :C2, :, :TR * Wp]
           .reshape(N, C2, T * TR, Wp)[:, :, :H, :W])
    return out


def make_bottleneck_params(c1, c2, e=0.5, seed=0):
    """Deterministic parameter init mirroring the PyTorch module's shapes."""
    c_ = int(c2 * e)
    keys = jax.random.split(jax.random.PRNGKey(seed), 6)
    p = {
        "w1": 0.1 * jax.random.normal(keys[0], (c_, c1, 3, 3), jnp.float32),
        "g1": 1.0 + 0.1 * jax.random.normal(keys[1], (c_,), jnp.float32),
        "b1": 0.1 * jax.random.normal(keys[2], (c_,), jnp.float32),
        "m1": jnp.zeros((c_,), jnp.float32),
        "v1": jnp.ones((c_,), jnp.float32),
        "w2": 0.1 * jax.random.normal(keys[3], (c2, c_, 3, 3), jnp.float32),
        "g2": 1.0 + 0.1 * jax.random.normal(keys[4], (c2,), jnp.float32),
        "b2": 0.1 * jax.random.normal(keys[5], (c2,), jnp.float32),
        "m2": jnp.zeros((c2,), jnp.float32),
        "v2": jnp.ones((c2,), jnp.float32),
    }
    return p, c_


# ------------------------- pure-JAX reference check ------------------------- #

def _ref_conv_bn_silu(x_nchw, w, g, b, m, v, eps=1e-5):
    y = jax.lax.conv_general_dilated(
        x_nchw, w, window_strides=(1, 1), padding=((1, 1), (1, 1)),
        dimension_numbers=("NCHW", "OIHW", "NCHW"))
    scale = (g / jnp.sqrt(v + eps)).reshape(1, -1, 1, 1)
    bias = (b - m * g / jnp.sqrt(v + eps)).reshape(1, -1, 1, 1)
    y = y * scale + bias
    return y * jax.nn.sigmoid(y)


def _ref_bottleneck(x, p, shortcut=True):
    add = shortcut and (x.shape[1] == p["w2"].shape[0])
    y = _ref_conv_bn_silu(x, p["w1"], p["g1"], p["b1"], p["m1"], p["v1"])
    y = _ref_conv_bn_silu(y, p["w2"], p["g2"], p["b2"], p["m2"], p["v2"])
    return x + y if add else y


# ---------------------------------- main ------------------------------------ #

if __name__ == "__main__":
    N, C, H, W = 2, 4, 16, 16          # small shapes consistent with the module
    c1 = c2 = C                        # shortcut active since c1 == c2

    params, c_hidden = make_bottleneck_params(c1, c2, e=0.5, seed=0)
    x = jax.random.normal(jax.random.PRNGKey(0), (N, C, H, W), jnp.float32)

    out = jax.block_until_ready(bottleneck_forward(x, params, shortcut=True))
    ref = jax.block_until_ready(_ref_bottleneck(x, params, shortcut=True))

    assert out.shape == (N, c2, H, W)
    out_f32 = out.astype(jnp.float32)
    err = jnp.max(jnp.abs(out_f32 - ref))
    # bf16 operands + bf16 output + EUP tanh sigmoid -> compare loosely.
    assert jnp.allclose(out_f32, ref, rtol=5e-2, atol=5e-2), (
        f"mismatch vs reference: max abs err {err:.4f}")

    print("KERNEL_OK")
</pallas_src>

<mosaic_0001>
module attributes {stable_mosaic.version = 11 : i64} {
  func.func @_bottleneck_kernel(%arg0: i32, %arg1: i32, %arg2: memref<1x1x8x666xbf16, #tpu.memory_space<vmem>>, %arg3: memref<3x8x24xbf16, #tpu.memory_space<vmem>>, %arg4: memref<8x1xf32, #tpu.memory_space<vmem>>, %arg5: memref<1x1x512xbf16, #tpu.memory_space<vmem>>, %arg6: memref<3x8x24xbf16, #tpu.memory_space<vmem>>, %arg7: memref<8x1xf32, #tpu.memory_space<vmem>>, %arg8: memref<1x8x384xbf16, #tpu.memory_space<vmem>>, %arg9: memref<8x512xbf16, #tpu.memory_space<vmem>>) attributes {dimension_semantics = [#tpu.dimension_semantics<parallel>, #tpu.dimension_semantics<parallel>], iteration_bounds = array<i64: 2, 1>, scalar_prefetch = 0 : i64, scratch_operands = 1 : i64, tpu.core_type = #tpu.core_type<tc>, window_params = [{transform_indices = @transform_0, window_bounds = array<i64: 1, 1, 8, 666>}, {pipeline_mode = #tpu.pipeline_mode<synchronous>, transform_indices = @transform_1, window_bounds = array<i64: 3, 8, 24>}, {pipeline_mode = #tpu.pipeline_mode<synchronous>, transform_indices = @transform_2, window_bounds = array<i64: 8, 1>}, {transform_indices = @transform_3, window_bounds = array<i64: 1, 1, 512>}, {pipeline_mode = #tpu.pipeline_mode<synchronous>, transform_indices = @transform_4, window_bounds = array<i64: 3, 8, 24>}, {pipeline_mode = #tpu.pipeline_mode<synchronous>, transform_indices = @transform_5, window_bounds = array<i64: 8, 1>}, {transform_indices = @transform_6, window_bounds = array<i64: 1, 8, 384>}]} {
    %c0 = arith.constant 0 : index
    %c0_0 = arith.constant 0 : index
    %c0_1 = arith.constant 0 : index
    %c17 = arith.constant 17 : index
    %0 = vector.load %arg2[%c0, %c0_0, %c0_1, %c17] : memref<1x1x8x666xbf16, #tpu.memory_space<vmem>>, vector<1x1x8x640xbf16>
    %1 = vector.shape_cast %0 : vector<1x1x8x640xbf16> to vector<8x640xbf16>
    %c0_2 = arith.constant 0 : index
    %c0_3 = arith.constant 0 : index
    %c0_4 = arith.constant 0 : index
    %c18 = arith.constant 18 : index
    %2 = vector.load %arg2[%c0_2, %c0_3, %c0_4, %c18] : memref<1x1x8x666xbf16, #tpu.memory_space<vmem>>, vector<1x1x8x640xbf16>
    %3 = vector.shape_cast %2 : vector<1x1x8x640xbf16> to vector<8x640xbf16>
    %c0_5 = arith.constant 0 : index
    %c0_6 = arith.constant 0 : index
    %c0_7 = arith.constant 0 : index
    %c19 = arith.constant 19 : index
    %4 = vector.load %arg2[%c0_5, %c0_6, %c0_7, %c19] : memref<1x1x8x666xbf16, #tpu.memory_space<vmem>>, vector<1x1x8x640xbf16>
    %5 = vector.shape_cast %4 : vector<1x1x8x640xbf16> to vector<8x640xbf16>
    %6 = tpu.concatenate %1, %3, %5 in 0 : vector<8x640xbf16>, vector<8x640xbf16>, vector<8x640xbf16> -> vector<24x640xbf16>
    %c0_8 = arith.constant 0 : index
    %c0_9 = arith.constant 0 : index
    %c0_10 = arith.constant 0 : index
    %7 = vector.load %arg3[%c0_8, %c0_9, %c0_10] : memref<3x8x24xbf16, #tpu.memory_space<vmem>>, vector<1x8x24xbf16>
    %8 = vector.shape_cast %7 : vector<1x8x24xbf16> to vector<8x24xbf16>
    %9 = vector.extract_strided_slice %6 {offsets = [0, 0], sizes = [24, 512], strides = [1, 1]} : vector<24x640xbf16> to vector<24x512xbf16>
    %cst = arith.constant dense<0.000000e+00> : vector<8x512xf32>
    %10 = tpu.matmul %8, %9, %cst {dimension_numbers = #tpu.dot_dimension_numbers<[1], [0], [0], [1], [0, 0, 1, 1], [], []>} : vector<8x24xbf16>, vector<24x512xbf16>, vector<8x512xf32> -> vector<8x512xf32>
    %c1 = arith.constant 1 : index
    %c0_11 = arith.constant 0 : index
    %c0_12 = arith.constant 0 : index
    %11 = vector.load %arg3[%c1, %c0_11, %c0_12] : memref<3x8x24xbf16, #tpu.memory_space<vmem>>, vector<1x8x24xbf16>
    %12 = vector.shape_cast %11 : vector<1x8x24xbf16> to vector<8x24xbf16>
    %13 = vector.extract_strided_slice %6 {offsets = [0, 18], sizes = [24, 512], strides = [1, 1]} : vector<24x640xbf16> to vector<24x512xbf16>
    %cst_13 = arith.constant dense<0.000000e+00> : vector<8x512xf32>
    %14 = tpu.matmul %12, %13, %cst_13 {dimension_numbers = #tpu.dot_dimension_numbers<[1], [0], [0], [1], [0, 0, 1, 1], [], []>} : vector<8x24xbf16>, vector<24x512xbf16>, vector<8x512xf32> -> vector<8x512xf32>
    %15 = arith.addf %10, %14 : vector<8x512xf32>
    %c2 = arith.constant 2 : index
    %c0_14 = arith.constant 0 : index
    %c0_15 = arith.constant 0 : index
    %16 = vector.load %arg3[%c2, %c0_14, %c0_15] : memref<3x8x24xbf16, #tpu.memory_space<vmem>>, vector<1x8x24xbf16>
    %17 = vector.shape_cast %16 : vector<1x8x24xbf16> to vector<8x24xbf16>
    %18 = vector.extract_strided_slice %6 {offsets = [0, 36], sizes = [24, 512], strides = [1, 1]} : vector<24x640xbf16> to vector<24x512xbf16>
    %cst_16 = arith.constant dense<0.000000e+00> : vector<8x512xf32>
    %19 = tpu.matmul %17, %18, %cst_16 {dimension_numbers = #tpu.dot_dimension_numbers<[1], [0], [0], [1], [0, 0, 1, 1], [], []>} : vector<8x24xbf16>, vector<24x512xbf16>, vector<8x512xf32> -> vector<8x512xf32>
    %20 = arith.addf %15, %19 : vector<8x512xf32>
    %c0_17 = arith.constant 0 : index
    %c0_18 = arith.constant 0 : index
    %21 = vector.load %arg4[%c0_17, %c0_18] : memref<8x1xf32, #tpu.memory_space<vmem>>, vector<8x1xf32>
    %22 = vector.broadcast %21 : vector<8x1xf32> to vector<8x512xf32>
    %23 = arith.addf %20, %22 : vector<8x512xf32>
    %cst_19 = arith.constant 5.000000e-01 : f32
    %24 = vector.broadcast %cst_19 : f32 to vector<8x512xf32>
    %25 = arith.mulf %24, %23 : vector<8x512xf32>
    %26 = math.tanh %25 : vector<8x512xf32>
    %cst_20 = arith.constant 5.000000e-01 : f32
    %27 = vector.broadcast %cst_20 : f32 to vector<8x512xf32>
    %28 = arith.mulf %27, %26 : vector<8x512xf32>
    %cst_21 = arith.constant 5.000000e-01 : f32
    %29 = vector.broadcast %cst_21 : f32 to vector<8x512xf32>
    %30 = arith.addf %28, %29 : vector<8x512xf32>
    %31 = arith.mulf %23, %30 : vector<8x512xf32>
    %c0_22 = arith.constant 0 : index
    %c0_23 = arith.constant 0 : index
    %c0_24 = arith.constant 0 : index
    %32 = vector.load %arg5[%c0_22, %c0_23, %c0_24] : memref<1x1x512xbf16, #tpu.memory_space<vmem>>, vector<1x1x512xbf16>
    %33 = vector.shape_cast %32 : vector<1x1x512xbf16> to vector<1x512xbf16>
    %34 = arith.extf %33 : vector<1x512xbf16> to vector<1x512xf32>
    %35 = vector.broadcast %34 : vector<1x512xf32> to vector<8x512xf32>
    %36 = arith.mulf %31, %35 : vector<8x512xf32>
    %37 = arith.truncf %36 : vector<8x512xf32> to vector<8x512xbf16>
    %c0_25 = arith.constant 0 : index
    %c0_26 = arith.constant 0 : index
    %38 = vector.load %arg9[%c0_25, %c0_26] : memref<8x512xbf16, #tpu.memory_space<vmem>>, vector<8x512xbf16>
    tpu.vector_store %arg9[%c0_25, %c0_26], %37 {strides = array<i32>} : memref<8x512xbf16, #tpu.memory_space<vmem>>, vector<8x512xbf16>,
    %c0_27 = arith.constant 0 : index
    %c0_28 = arith.constant 0 : index
    %39 = vector.load %arg9[%c0_27, %c0_28] : memref<8x512xbf16, #tpu.memory_space<vmem>>, vector<8x420xbf16>
    %c0_29 = arith.constant 0 : index
    %c1_30 = arith.constant 1 : index
    %40 = vector.load %arg9[%c0_29, %c1_30] : memref<8x512xbf16, #tpu.memory_space<vmem>>, vector<8x420xbf16>
    %c0_31 = arith.constant 0 : index
    %c2_32 = arith.constant 2 : index
    %41 = vector.load %arg9[%c0_31, %c2_32] : memref<8x512xbf16, #tpu.memory_space<vmem>>, vector<8x420xbf16>
    %42 = tpu.concatenate %39, %40, %41 in 0 : vector<8x420xbf16>, vector<8x420xbf16>, vector<8x420xbf16> -> vector<24x420xbf16>
    %c0_33 = arith.constant 0 : index
    %c0_34 = arith.constant 0 : index
    %c0_35 = arith.constant 0 : index
    %43 = vector.load %arg6[%c0_33, %c0_34, %c0_35] : memref<3x8x24xbf16, #tpu.memory_space<vmem>>, vector<1x8x24xbf16>
    %44 = vector.shape_cast %43 : vector<1x8x24xbf16> to vector<8x24xbf16>
    %45 = vector.extract_strided_slice %42 {offsets = [0, 0], sizes = [24, 384], strides = [1, 1]} : vector<24x420xbf16> to vector<24x384xbf16>
    %cst_36 = arith.constant dense<0.000000e+00> : vector<8x384xf32>
    %46 = tpu.matmul %44, %45, %cst_36 {dimension_numbers = #tpu.dot_dimension_numbers<[1], [0], [0], [1], [0, 0, 1, 1], [], []>} : vector<8x24xbf16>, vector<24x384xbf16>, vector<8x384xf32> -> vector<8x384xf32>
    %c1_37 = arith.constant 1 : index
    %c0_38 = arith.constant 0 : index
    %c0_39 = arith.constant 0 : index
    %47 = vector.load %arg6[%c1_37, %c0_38, %c0_39] : memref<3x8x24xbf16, #tpu.memory_space<vmem>>, vector<1x8x24xbf16>
    %48 = vector.shape_cast %47 : vector<1x8x24xbf16> to vector<8x24xbf16>
    %49 = vector.extract_strided_slice %42 {offsets = [0, 18], sizes = [24, 384], strides = [1, 1]} : vector<24x420xbf16> to vector<24x384xbf16>
    %cst_40 = arith.constant dense<0.000000e+00> : vector<8x384xf32>
    %50 = tpu.matmul %48, %49, %cst_40 {dimension_numbers = #tpu.dot_dimension_numbers<[1], [0], [0], [1], [0, 0, 1, 1], [], []>} : vector<8x24xbf16>, vector<24x384xbf16>, vector<8x384xf32> -> vector<8x384xf32>
    %51 = arith.addf %46, %50 : vector<8x384xf32>
    %c2_41 = arith.constant 2 : index
    %c0_42 = arith.constant 0 : index
    %c0_43 = arith.constant 0 : index
    %52 = vector.load %arg6[%c2_41, %c0_42, %c0_43] : memref<3x8x24xbf16, #tpu.memory_space<vmem>>, vector<1x8x24xbf16>
    %53 = vector.shape_cast %52 : vector<1x8x24xbf16> to vector<8x24xbf16>
    %54 = vector.extract_strided_slice %42 {offsets = [0, 36], sizes = [24, 384], strides = [1, 1]} : vector<24x420xbf16> to vector<24x384xbf16>
    %cst_44 = arith.constant dense<0.000000e+00> : vector<8x384xf32>
    %55 = tpu.matmul %53, %54, %cst_44 {dimension_numbers = #tpu.dot_dimension_numbers<[1], [0], [0], [1], [0, 0, 1, 1], [], []>} : vector<8x24xbf16>, vector<24x384xbf16>, vector<8x384xf32> -> vector<8x384xf32>
    %56 = arith.addf %51, %55 : vector<8x384xf32>
    %c0_45 = arith.constant 0 : index
    %c0_46 = arith.constant 0 : index
    %57 = vector.load %arg7[%c0_45, %c0_46] : memref<8x1xf32, #tpu.memory_space<vmem>>, vector<8x1xf32>
    %58 = vector.broadcast %57 : vector<8x1xf32> to vector<8x384xf32>
    %59 = arith.addf %56, %58 : vector<8x384xf32>
    %cst_47 = arith.constant 5.000000e-01 : f32
    %60 = vector.broadcast %cst_47 : f32 to vector<8x384xf32>
    %61 = arith.mulf %60, %59 : vector<8x384xf32>
    %62 = math.tanh %61 : vector<8x384xf32>
    %cst_48 = arith.constant 5.000000e-01 : f32
    %63 = vector.broadcast %cst_48 : f32 to vector<8x384xf32>
    %64 = arith.mulf %63, %62 : vector<8x384xf32>
    %cst_49 = arith.constant 5.000000e-01 : f32
    %65 = vector.broadcast %cst_49 : f32 to vector<8x384xf32>
    %66 = arith.addf %64, %65 : vector<8x384xf32>
    %67 = arith.mulf %59, %66 : vector<8x384xf32>
    %c0_50 = arith.constant 0 : index
    %c0_51 = arith.constant 0 : index
    %c0_52 = arith.constant 0 : index
    %c55 = arith.constant 55 : index
    %68 = vector.load %arg2[%c0_50, %c0_51, %c0_52, %c55] : memref<1x1x8x666xbf16, #tpu.memory_space<vmem>>, vector<1x1x8x384xbf16>
    %69 = vector.shape_cast %68 : vector<1x1x8x384xbf16> to vector<8x384xbf16>
    %70 = arith.extf %69 : vector<8x384xbf16> to vector<8x384xf32>
    %71 = arith.addf %67, %70 : vector<8x384xf32>
    %72 = arith.truncf %71 : vector<8x384xf32> to vector<8x384xbf16>
    %c0_53 = arith.constant 0 : index
    %c0_54 = arith.constant 0 : index
    %c0_55 = arith.constant 0 : index
    %73 = vector.load %arg8[%c0_53, %c0_54, %c0_55] : memref<1x8x384xbf16, #tpu.memory_space<vmem>>, vector<1x8x384xbf16>
    %74 = vector.shape_cast %73 : vector<1x8x384xbf16> to vector<8x384xbf16>
    %75 = vector.shape_cast %72 : vector<8x384xbf16> to vector<1x8x384xbf16>
    tpu.vector_store %arg8[%c0_53, %c0_54, %c0_55], %75 {strides = array<i32>} : memref<1x8x384xbf16, #tpu.memory_space<vmem>>, vector<1x8x384xbf16>,
    return
  }
  func.func @transform_0(%arg0: i32, %arg1: i32) -> (i32, i32, i32, i32) {
    %c0_i32 = arith.constant 0 : i32
    %c0_i32_0 = arith.constant 0 : i32
    %c0_i32_1 = arith.constant 0 : i32
    return %arg0, %arg1, %c0_i32, %c0_i32_0 : i32, i32, i32, i32
  }
  func.func @transform_1(%arg0: i32, %arg1: i32) -> (i32, i32, i32) {
    %c0_i32 = arith.constant 0 : i32
    %c0_i32_0 = arith.constant 0 : i32
    %c0_i32_1 = arith.constant 0 : i32
    %c0_i32_2 = arith.constant 0 : i32
    return %c0_i32, %c0_i32_0, %c0_i32_1 : i32, i32, i32
  }
  func.func @transform_2(%arg0: i32, %arg1: i32) -> (i32, i32) {
    %c0_i32 = arith.constant 0 : i32
    %c0_i32_0 = arith.constant 0 : i32
    %c0_i32_1 = arith.constant 0 : i32
    return %c0_i32, %c0_i32_0 : i32, i32
  }
  func.func @transform_3(%arg0: i32, %arg1: i32) -> (i32, i32, i32) {
    %c0_i32 = arith.constant 0 : i32
    %c0_i32_0 = arith.constant 0 : i32
    %c0_i32_1 = arith.constant 0 : i32
    return %arg1, %c0_i32, %c0_i32_0 : i32, i32, i32
  }
  func.func @transform_4(%arg0: i32, %arg1: i32) -> (i32, i32, i32) {
    %c0_i32 = arith.constant 0 : i32
    %c0_i32_0 = arith.constant 0 : i32
    %c0_i32_1 = arith.constant 0 : i32
    %c0_i32_2 = arith.constant 0 : i32
    return %c0_i32, %c0_i32_0, %c0_i32_1 : i32, i32, i32
  }
  func.func @transform_5(%arg0: i32, %arg1: i32) -> (i32, i32) {
    %c0_i32 = arith.constant 0 : i32
    %c0_i32_0 = arith.constant 0 : i32
    %c0_i32_1 = arith.constant 0 : i32
    return %c0_i32, %c0_i32_0 : i32, i32
  }
  func.func @transform_6(%arg0: i32, %arg1: i32) -> (i32, i32, i32) {
    %c0_i32 = arith.constant 0 : i32
    %c0_i32_0 = arith.constant 0 : i32
    return %arg0, %c0_i32, %arg1 : i32, i32, i32
  }
}

</mosaic_0001>

<bundles_post_ra>
// kernel: tpu_custom_call.1
= control target key start
LH: loop header
LB: loop body
LE: loop exit
PB: predicated region body
PF: predicated region fallthrough
CT: control target
= control target key end

     0   :  { %s1903_s0 = inlined_call_operand.hbm [shape: bf16[2,1,8,666], index: 0, kind: input, shape index: {}]   ;;  %s1904_s1 = inlined_call_operand.vmem [shape: bf16[3,8,24], index: 1, kind: input, shape index: {}]   ;;  %s1905_s2 = inlined_call_operand.vmem [shape: f32[8,1], index: 2, kind: input, shape index: {}]   ;;  %s1906_s3 = inlined_call_operand.vmem [shape: bf16[1,1,512], index: 3, kind: input, shape index: {}]   ;;  %s1907_s4 = inlined_call_operand.hbm [shape: bf16[3,8,24], index: 4, kind: input, shape index: {}]   ;;  %s1908_s5 = inlined_call_operand.vmem [shape: f32[8,1], index: 5, kind: input, shape index: {}]   ;;  %s1909_s6 = inlined_call_operand.hbm [shape: bf16[2,8,384], index: 6, kind: output, shape index: {}]  }
   0x1   :  { %1911 = sst [smem:[#allocation13_spill]] %s1907_s4 }
   0x2   :  { %11 = vsyncpa [#allocation4], 0 }
   0x3   :  { %13 = vsyncpa [#allocation4 + $0x1], 0 }
   0x4   :  { %14 = vsyncpa [#allocation7], 0 }
   0x5   :  { %15 = vsyncpa [#allocation5], 0 }
   0x6   :  { %17 = vsyncpa [#allocation5 + $0x1], 0  ;;  %s1557_s21 = smov 0   ;;  %s1559_s22 = smov 0  }
   0x7   :  { %s1561_s23 = smov 0   ;;  %s1563_s24 = smov 0  }
   0x8   :  { %s1565_s25 = smov 0   ;;  %s1567_s26 = smov 0  }
   0x9 LB: > { %s1212_s27 = sadd.s32 4294967295, %s1508_s26   ;;  %p1214_p0 = scmp.ge.s32.totalorder %s1508_s26, 1  ;;  %s1508_s26 = sphi %s1567_s26, %s23_s26   ;;  %s1504_s25 = sphi %s1565_s25, %s1925_s25   ;;  %s1500_s24 = sphi %s1563_s24, %s1924_s24   ;;  %s1496_s23 = sphi %s1561_s23, %s1923_s23   ;;  %s1492_s22 = sphi %s1559_s22, %s1922_s22   ;;  %s1488_s21 = sphi %s1557_s21, %s1921_s21  }
   0xa   : > { %p1589_p1 = scmp.eq.s32.totalorder %s1212_s27, 0  ;;  %p206_p2 = scmp.lt.s32.totalorder %s1508_s26, 3 }
   0xb   : > { %s1913_s4 = sld [smem:[#allocation13_spill]]  ;;  %s1510_s9 = smov [#allocation6]  }
   0xc   : > { %p1597_p3 = pnand %p1214_p0, %p206_p2  ;;  %s232_s10 = sshll.u32 %s1510_s9, 4  ;;  %s233_s10 = int_to_ptr.vmem [resolvable:$true] %s232_s10 }
   0xd   : > { %p1217_p6 = scmp.ge.s32.totalorder %s1508_s26, 2  ;;  %s1511_s11 = smov 64  }
   0xe   : > { %p1260_p4 = pneg %p1597_p3  ;;  %s1512_s12 = smov 4  }
   0xf   : > { %s1213_s13 = sadd.s32 4294967294, %s1508_s26   ;;  %s35_s14 = sadd.s32 1, %s1504_s25 }
  0x10   : > { %p1261_p5 = pnand %p1260_p4, %p1589_p1  ;;  %s44_s15 = sadd.s32 1, %s1496_s23 }
  0x11   : > { %s230_s7 = sshll.u32 %s1913_s4, 4  ;;  %p37_p7 = scmp.ge.s32.totalorder %s35_s14, 2  ;;  %s231_s7 = int_to_ptr.hbm [resolvable:$true] %s230_s7 }
  0x12   : > { %1263 = dma.hbm_to_vmem [thread:$0]  (!%p1261_p5), %s231_s7, 192, %s233_s10, [#allocation7], %s1511_s11, %s1511_s11, %s1512_s12  }
  0x13   : > { %p51_p8 = scmp.ne.s32.totalorder %s1496_s23, %s1492_s22  ;;  %p52_p9 = scmp.eq.s32.totalorder %s1508_s26, 0 }
  0x14   : > { %p57_p10 = scmp.ne.s32.totalorder %s1492_s22, %s1488_s21  ;;  %s1927_s14 = smov (%p37_p7, %s35_s14), 0 }
  0x15   : > { %1915 = sst [smem:[#allocation12_spill]] %s1927_s14  ;;  %p1616_p11 = por %p52_p9, %p51_p8 }
  0x16   : > { %p1622_p12 = por %p1589_p1, %p57_p10  ;;  %s39_s18 = ssub.s32 %s1504_s25, %s1927_s14 }
  0x17   : > { %p193_p13 = scmp.eq.s32.totalorder %s1212_s27, 1  ;;  %p42_p0 = scmp.eq.s32.totalorder %s39_s18, 0 }
  0x18   : > { %p199_p2 = scmp.eq.s32.totalorder %s1213_s13, 1  ;;  %p1273_p5 = scmp.lt.s32.totalorder %s1508_s26, 2 }
  0x19   : > { %p1628_p4 = por %p193_p13, %p51_p8  ;;  %s249_s30 = sand.u32 1, %s1496_s23  }
  0x1a   : > { %s1634_s20 = scalar_select %p42_p0, %s1496_s23, %s44_s15  }
  0x1b   : > { %p1636_p7 = por %p199_p2, %p57_p10  ;;  %s1247_s7 = smul.u32 24, %s249_s30 }
  0x1c   : > { %s1248_s9 = smul.u32 24, %s1504_s25  ;;  %p1265_p9 = pnand %p1273_p5, %p1616_p11 }
  0x1d   : > { %s253_s12 = scalar_lea.vmem [#allocation3], %s1247_s7  ;;  %s250_s15 = scalar_lea.sflag [#allocation4], %s249_s30 }
  0x1e   : > { %s260_s11 = scalar_lea.hbm %s1903_s0, %s1248_s9  ;;  %s264_s13 = sshll.u32 %s253_s12, 4  ;;  %s265_s13 = int_to_ptr.vmem [resolvable:$true] %s264_s13 }
  0x1f   : > { %s262_s18 = sshll.u32 %s260_s11, 4  ;;  %273 = sbr.rel (%p1597_p3) target bundleno = 965 (0x3c5), region = 44  ;;  %s263_s18 = int_to_ptr.hbm [resolvable:$true] %s262_s18 }
  0x20   : > { %1267 = dma.hbm_to_vmem [thread:$0]  (!%p1265_p9), %s263_s18, 384, %s265_s13, %s250_s15  }
  0x21   : > { %s1650_s4 = sand.u32 (!%p1597_p3), 1, %s1492_s22  }
  0x22   : > { %s1249_s16 = smul.u32 (!%p1597_p3), 24, %s1650_s4  ;;  %s276_s14 = scalar_lea.sflag (!%p1597_p3), [#allocation4], %s1650_s4 }
  0x24   : > { %s279_s10 = scalar_lea.vmem [#allocation3], %s1249_s16 }
  0x25   : > { %1475 = dma.done.wait (%p1622_p12), %s276_s14, 384  }
  0x26   : > { %1477 = vsyncadd (%p1622_p12), %s276_s14, 4294966912 }
  0x27   : > { %1479 = dma.done.wait (%p1589_p1), [#allocation7], 192  }
  0x28   : > { %1481 = vsyncadd (%p1589_p1), [#allocation7], 4294967104  ;;  %v326_v0 = vld [vmem:[%s279_s10 + $0x10] sm:$0xff]  ;;  %v1662_v1 = vld [vmem:[%s279_s10 + $0x8] sm:$0xff]  ;;  %s1513_s8 = smov 126   ;;  %s1514_s28 = smov 127  }
  0x29   : > { %v334_v2 = vunpack.c.l.b16 %v326_v0  ;;  %v332_v3 = vunpack.c.l.b16 %v1662_v1  ;;  %v340_v6 = vunpack.c.h.b16 %v326_v0  ;;  %v333_v7 = vunpack.c.h.b16 %v1662_v1  ;;  %v1673_v10 = vld [vmem:[%s279_s10] sm:$0xff]  ;;  %s1515_s14 = smov 93   ;;  %s1516_s17 = smov 111  }
  0x2a   : > { %v330_v11 = vunpack.c.l.b16 %v1673_v10  ;;  %v331_v13 = vunpack.c.h.b16 %v1673_v10  ;;  %vm372_vm0 = vcmask 1031168   ;;  %s1517_s30 = smov 75   ;;  %vm354_vm1 = vcmask 1039360   ;;  %s1250_s7 = smul.u32 12, %s1650_s4 }
  0x2b   : > { %v339_v4 = vpack.c.b16 %v334_v2, %v334_v2  ;;  %v1665_v5 = vpack.c.b16 %v332_v3, %v332_v3  ;;  %v341_v8 = vpack.c.b16 %v340_v6, %v340_v6  ;;  %v338_v9 = vpack.c.b16 %v333_v7, %v333_v7  ;;  %s1251_s9 = smul.u32 12, %s1500_s24  ;;  %s1085_s15 = scalar_lea.sflag [#allocation5], %s1650_s4 }
  0x2c   : > { %v335_v12 = vpack.c.b16 %v330_v11, %v330_v11  ;;  %v336_v14 = vpack.c.b16 %v331_v13, %v331_v13  ;;  %vm378_vm2 = vcmask 1043456   ;;  %vm422_vm3 = vcmask 760832   ;;  %s317_s24 = scalar_lea.vmem [#allocation8], %s1250_s7 }
  0x2d   : > { %368 = vrot.lane.b32.xlu1 %v339_v4, %s1513_s8  ;;  %364 = vrot.lane.b32.xlu0 %v1665_v5, %s1513_s8  ;;  %vm523_vm4 = vcmask 908288   ;;  %vm435_vm5 = vcmask 195584   ;;  %vm625_vm6 = vcmask 613376   ;;  %vm834_vm7 = vcmask 900096   ;;  %s1098_s12 = scalar_lea.hbm %s1909_s6, %s1251_s9  ;;  %s1100_s13 = sshll.u32 %s317_s24, 4  ;;  %s1101_s13 = int_to_ptr.vmem [resolvable:$true] %s1100_s13 }
  0x2e   : > { %346 = vrot.lane.b32.xlu2 %v1665_v5, %s1514_s28  ;;  %vm964_vm8 = vcmask 752640   ;;  %vm1070_vm9 = vcmask 596992   ;;  %s1102_s18 = sshll.u32 %s1098_s12, 4  ;;  %s1103_s18 = int_to_ptr.hbm [resolvable:$true] %s1102_s18 }
  0x2f   : > { %s1436_s16 = sshra.s32 %s1103_s18, 4  ;;  %s1437_s16 = int_to_ptr.hbm [resolvable:$true] %s1436_s16 }
  0x30   : > { %s1438_s10 = scalar_lea.hbm %s1437_s16, 12  ;;  %p1443_p10 = scmp.lt.s32.totalorder %s1437_s16, %s1909_s6 }
  0x31   : > { %p1439_p1 = scmp.ne.s32.totalorder %s1437_s16, %s1438_s10 }
  0x33   : > { %p1440_p3 = pnand %p1439_p1, %p1628_p4 }
  0x35   : > { %370 = vrot.lane.b32.xlu1 %v341_v8, %s1513_s8  ;;  %366 = vrot.lane.b32.xlu0 %v338_v9, %s1513_s8  ;;  %p1441_p8 = pneg %p1440_p3 }
  0x36   : > { %348 = vrot.lane.b32.xlu2 %v338_v9, %s1514_s28 }
  0x3d   : > { %352 = vrot.lane.b32.xlu1 %v341_v8, %s1514_s28  ;;  %350 = vrot.lane.b32.xlu0 %v339_v4, %s1514_s28 }
  0x3e   : > { %360 = vrot.lane.b32.xlu2 %v335_v12, %s1513_s8 }
  0x45   : > { %362 = vrot.lane.b32.xlu0 %v336_v14, %s1513_s8  ;;  %342 = vrot.lane.b32.xlu1 %v335_v12, %s1514_s28 }
  0x46   : > { %344 = vrot.lane.b32.xlu2 %v336_v14, %s1514_s28 }
  0x88   : > { %v347_v17 = vpop.permute.xlu2 %346 }
  0x90   : > { %v349_v23 = vpop.permute.xlu2 %348 }
  0x91   : > { %v357_v35 = vsel %vm354_vm1, %v347_v17, %v349_v23 }
  0x92   : > { %v387_v39 = vsel %vm378_vm2, %v1665_v5, %v357_v35 }
  0x98   : > { %v361_v25 = vpop.permute.xlu2 %360 }
  0x9f   : > { %v369_v15 = vpop.permute.xlu1 %368  ;;  %v365_v16 = vpop.permute.xlu0 %364 }
  0xa0   : > { %v345_v33 = vpop.permute.xlu2 %344 }
  0xa1   : > { %v356_v40 = vsel %vm354_vm1, %v345_v33, %v347_v17 }
  0xa2   : > { %v384_v41 = vsel %vm378_vm2, %v336_v14, %v356_v40 }
  0xa7   : > { %v371_v18 = vpop.permute.xlu1 %370  ;;  %v367_v19 = vpop.permute.xlu0 %366 }
  0xa8   : > { %v375_v20 = vsel %vm372_vm0, %v365_v16, %v367_v19  ;;  %v376_v21 = vsel %vm372_vm0, %v367_v19, %v369_v15  ;;  %v377_v22 = vsel %vm372_vm0, %v369_v15, %v371_v18 }
  0xa9   : > { %416 = vrot.lane.b32.xlu0 %v375_v20, %s1515_s14  ;;  %418 = vrot.lane.b32.xlu1 %v376_v21, %s1515_s14 }
  0xaa   : > { %420 = vrot.lane.b32.xlu2 %v377_v22, %s1515_s14 }
  0xaf   : > { %v351_v24 = vpop.permute.xlu0 %350  ;;  %v353_v29 = vpop.permute.xlu1 %352 }
  0xb0   : > { %v359_v30 = vsel %vm354_vm1, %v351_v24, %v353_v29  ;;  %v358_v36 = vsel %vm354_vm1, %v349_v23, %v351_v24  ;;  %v709_v29 = vld [vmem:[%s1905_s2] sm:$0xff] }
  0xb1   : > { %v393_v31 = vsel %vm378_vm2, %v339_v4, %v359_v30  ;;  %v390_v38 = vsel %vm378_vm2, %v338_v9, %v358_v36  ;;  %v1221_v9 = vld [vmem:[%s1904_s1 + $0x4] sm:$0xf]  ;;  %v1518_v30 = vmov 0  }
  0xb2   : > { %519 = vrot.lane.b32.xlu2 %v376_v21, %s1516_s17  ;;  %1336 = vset.pattern.permute.xlu0 %v1518_v30 }
  0xb3   : > { %1337 = vset.pattern.permute.xlu2 %v1518_v30 }
  0xb7   : > { %v363_v26 = vpop.permute.xlu0 %362  ;;  %v343_v32 = vpop.permute.xlu1 %342 }
  0xb8   : > { %v374_v27 = vsel %vm372_vm0, %v363_v26, %v365_v16  ;;  %v373_v28 = vsel %vm372_vm0, %v361_v25, %v363_v26  ;;  %v355_v34 = vsel %vm354_vm1, %v343_v32, %v345_v33 }
  0xb9   : > { %414 = vrot.lane.b32.xlu1 %v374_v27, %s1515_s14  ;;  %412 = vrot.lane.b32.xlu0 %v373_v28, %s1515_s14  ;;  %v381_v37 = vsel %vm378_vm2, %v335_v12, %v355_v34 }
  0xba   : > { %515 = vrot.lane.b32.xlu2 %v374_v27, %s1516_s17 }
  0xc1   : > { %517 = vrot.lane.b32.xlu1 %v375_v20, %s1516_s17  ;;  %521 = vrot.lane.b32.xlu0 %v377_v22, %s1516_s17 }
  0xc2   : > { %619 = vrot.lane.b32.xlu2 %v375_v20, %s1517_s30 }
  0xc9   : > { %513 = vrot.lane.b32.xlu1 %v373_v28, %s1516_s17  ;;  %621 = vrot.lane.b32.xlu0 %v376_v21, %s1517_s30 }
  0xca   : > { %410 = vrot.lane.b32.xlu2 %v393_v31, %s1515_s14 }
  0xd1   : > { %408 = vrot.lane.b32.xlu1 %v390_v38, %s1515_s14  ;;  %406 = vrot.lane.b32.xlu0 %v387_v39, %s1515_s14 }
  0xd2   : > { %402 = vrot.lane.b32.xlu2 %v381_v37, %s1515_s14 }
  0xd9   : > { %623 = vrot.lane.b32.xlu1 %v377_v22, %s1517_s30  ;;  %404 = vrot.lane.b32.xlu0 %v384_v41, %s1515_s14  ;;  %s1519_s14 = smov 110  }
  0xda   : > { %509 = vrot.lane.b32.xlu2 %v390_v38, %s1516_s17 }
  0xe1   : > { %507 = vrot.lane.b32.xlu1 %v387_v39, %s1516_s17  ;;  %511 = vrot.lane.b32.xlu0 %v393_v31, %s1516_s17 }
  0xe2   : > { %615 = vrot.lane.b32.xlu2 %v373_v28, %s1517_s30  ;;  %v394_v28 = vld [vmem:[%s1904_s1] sm:$0xf] }
  0xe9   : > { %505 = vrot.lane.b32.xlu1 %v384_v41, %s1516_s17  ;;  %503 = vrot.lane.b32.xlu0 %v381_v37, %s1516_s17 }
  0xea   : > { %609 = vrot.lane.b32.xlu2 %v387_v39, %s1517_s30 }
  0xf1   : > { %613 = vrot.lane.b32.xlu1 %v393_v31, %s1517_s30  ;;  %611 = vrot.lane.b32.xlu0 %v390_v38, %s1517_s30 }
  0xf2   : > { %607 = vrot.lane.b32.xlu2 %v384_v41, %s1517_s30  ;;  %v1230_v41 = vld [vmem:[%s1904_s1 + $0x8] sm:$0xf] }
  0xf9   : > { %605 = vrot.lane.b32.xlu1 %v381_v37, %s1517_s30  ;;  %617 = vrot.lane.b32.xlu0 %v374_v27, %s1517_s30  ;;  %s1521_s30 = smov 73  }
 0x101   : > { %712 = vperm.xlu0 %1336, %v709_v29   ;;  %v739_v29 = vld [vmem:[%s1906_s3] sm:$0xf] }
 0x104   : > { %v421_v42 = vpop.permute.xlu2 %420 }
 0x10c   : > { %v520_v45 = vpop.permute.xlu2 %519 }
 0x114   : > { %v516_v50 = vpop.permute.xlu2 %515 }
 0x11b   : > { %v417_v43 = vpop.permute.xlu0 %416  ;;  %v419_v44 = vpop.permute.xlu1 %418 }
 0x11c   : > { %v429_v46 = vsel %vm422_vm3, %v417_v43, %v419_v44  ;;  %v430_v47 = vsel %vm422_vm3, %v419_v44, %v421_v42  ;;  %v1740_v57 = vpop.permute.xlu2 %619 }
 0x11d   : > { %v446_v48 = vsel %vm378_vm2, %v429_v46, 0  ;;  %v449_v49 = vsel %vm378_vm2, %v430_v47, 0 }
 0x11e   : > { %483 = vmatpush.bf16.msra.mxu2 %v446_v48  ;;  %496 = vmatpush.bf16.msra.mxu3 %v449_v49 }
 0x124   : > { %v411_v60 = vpop.permute.xlu2 %410 }
 0x12b   : > { %v415_v51 = vpop.permute.xlu1 %414  ;;  %v413_v52 = vpop.permute.xlu0 %412 }
 0x12c   : > { %v427_v53 = vsel %vm422_vm3, %v413_v52, %v415_v51  ;;  %v428_v54 = vsel %vm422_vm3, %v415_v51, %v417_v43  ;;  %v403_v4 = vpop.permute.xlu2 %402 }
 0x12d   : > { %v440_v55 = vsel %vm378_vm2, %v427_v53, 0  ;;  %v443_v56 = vsel %vm378_vm2, %v428_v54, 0 }
 0x12e   : > { %457 = vmatpush.bf16.msra.mxu0 %v440_v55  ;;  %470 = vmatpush.bf16.msra.mxu1 %v443_v56 }
 0x133   : > { %v518_v58 = vpop.permute.xlu1 %517  ;;  %v522_v59 = vpop.permute.xlu0 %521 }
 0x134   : > { %v530_v63 = vsel %vm523_vm4, %v518_v58, %v520_v45  ;;  %v531_v0 = vsel %vm523_vm4, %v520_v45, %v522_v59  ;;  %v529_v12 = vsel %vm523_vm4, %v516_v50, %v518_v58  ;;  %v510_v19 = vpop.permute.xlu2 %509 }
 0x135   : > { %v546_v7 = vsel %vm378_vm2, %v530_v63, 0  ;;  %v549_v8 = vsel %vm378_vm2, %v531_v0, 0  ;;  %v543_v18 = vsel %vm378_vm2, %v529_v12, 0 }
 0x13b   : > { %v514_v61 = vpop.permute.xlu1 %513  ;;  %v622_v62 = vpop.permute.xlu0 %621 }
 0x13c   : > { %v528_v11 = vsel %vm523_vm4, %v514_v61, %v516_v50  ;;  %v632_v20 = vsel %vm625_vm6, %v1740_v57, %v622_v62  ;;  %v616_v31 = vpop.permute.xlu2 %615 }
 0x13d   : > { %v540_v17 = vsel %vm378_vm2, %v528_v11, 0  ;;  %v648_v26 = vsel %vm378_vm2, %v632_v20, 0 }
 0x143   : > { %v409_v2 = vpop.permute.xlu1 %408  ;;  %v407_v3 = vpop.permute.xlu0 %406 }
 0x144   : > { %v425_v5 = vsel %vm422_vm3, %v407_v3, %v409_v2  ;;  %v426_v6 = vsel %vm422_vm3, %v409_v2, %v411_v60  ;;  %v610_v36 = vpop.permute.xlu2 %609 }
 0x145   : > { %484 = vmatpush.bf16.msra.mxu2 %v425_v5  ;;  %497 = vmatpush.bf16.msra.mxu3 %v426_v6 }
 0x148   : > { %1224 = vmatmul.msk.bf16.vlgmr.msra.gmra.mxu2 %vm435_vm5, %v1221_v9  ;;  %1225 = vmatmul.msk.bf16.vlgmr.msra.gmra.mxu3 %vm435_vm5, %v1221_v9 }
 0x149   : > { %583 = vmatpush.bf16.msrb.mxu2 %v546_v7  ;;  %596 = vmatpush.bf16.msrb.mxu3 %v549_v8 }
 0x14b   : > { %v624_v13 = vpop.permute.xlu1 %623  ;;  %v405_v14 = vpop.permute.xlu0 %404 }
 0x14c   : > { %v423_v15 = vsel %vm422_vm3, %v403_v4, %v405_v14  ;;  %v424_v16 = vsel %vm422_vm3, %v405_v14, %v407_v3  ;;  %v633_v21 = vsel %vm625_vm6, %v622_v62, %v624_v13  ;;  %v608_v47 = vpop.permute.xlu2 %607 }
 0x14d   : > { %458 = vmatpush.bf16.msra.mxu0 %v423_v15  ;;  %471 = vmatpush.bf16.msra.mxu1 %v424_v16  ;;  %v651_v27 = vsel %vm378_vm2, %v633_v21, 0  ;;  %v627_v50 = vsel %vm625_vm6, %v608_v47, %v610_v36 }
 0x150   : > { %1222 = vmatmul.msk.bf16.vlgmr.msra.gmra.mxu0 %vm435_vm5, %v1221_v9  ;;  %1223 = vmatmul.msk.bf16.vlgmr.msra.gmra.mxu1 %vm435_vm5, %v1221_v9 }
 0x151   : > { %557 = vmatpush.bf16.msrb.mxu0 %v540_v17  ;;  %570 = vmatpush.bf16.msrb.mxu1 %v543_v18 }
 0x153   : > { %v508_v22 = vpop.permute.xlu1 %507  ;;  %v512_v23 = vpop.permute.xlu0 %511 }
 0x154   : > { %v526_v24 = vsel %vm523_vm4, %v508_v22, %v510_v19  ;;  %v527_v25 = vsel %vm523_vm4, %v510_v19, %v512_v23 }
 0x155   : > { %584 = vmatpush.bf16.msrb.mxu2 %v526_v24  ;;  %597 = vmatpush.bf16.msrb.mxu3 %v527_v25 }
 0x158   : > { %1228 = vmatmul.msk.bf16.vlgmr.msrb.gmra.mxu2 %vm435_vm5, %v394_v28  ;;  %1229 = vmatmul.msk.bf16.vlgmr.msrb.gmra.mxu3 %vm435_vm5, %v394_v28 }
 0x159   : > { %685 = vmatpush.bf16.msra.mxu2 %v648_v26  ;;  %698 = vmatpush.bf16.msra.mxu3 %v651_v27 }
 0x15b   : > { %v506_v32 = vpop.permute.xlu1 %505  ;;  %v504_v33 = vpop.permute.xlu0 %503 }
 0x15c   : > { %v524_v34 = vsel %vm523_vm4, %v504_v33, %v506_v32  ;;  %v525_v35 = vsel %vm523_vm4, %v506_v32, %v508_v22  ;;  %v740_v33 = vunpack.c.l.bf16 %v739_v29 }
 0x15d   : > { %558 = vmatpush.bf16.msrb.mxu0 %v524_v34  ;;  %571 = vmatpush.bf16.msrb.mxu1 %v525_v35 }
 0x160   : > { %1226 = vmatmul.msk.bf16.vlgmr.msrb.gmra.mxu0 %vm435_vm5, %v394_v28  ;;  %1227 = vmatmul.msk.bf16.vlgmr.msrb.gmra.mxu1 %vm435_vm5, %v394_v28 }
 0x163   : > { %v614_v37 = vpop.permute.xlu1 %613  ;;  %v612_v38 = vpop.permute.xlu0 %611 }
 0x164   : > { %v628_v39 = vsel %vm625_vm6, %v610_v36, %v612_v38  ;;  %v629_v40 = vsel %vm625_vm6, %v612_v38, %v614_v37  ;;  %v742_v36 = vperm.slane %v740_v33, 0  ;;  %v743_v38 = vperm.slane %v740_v33, 2 }
 0x165   : > { %686 = vmatpush.bf16.msra.mxu2 %v628_v39  ;;  %699 = vmatpush.bf16.msra.mxu3 %v629_v40 }
 0x168   : > { %1233 = vmatmul.msk.bf16.vlgmr.msra.gmra.mxu2 %vm435_vm5, %v1230_v41  ;;  %1234 = vmatmul.msk.bf16.vlgmr.msra.gmra.mxu3 %vm435_vm5, %v1230_v41 }
 0x16b   : > { %v618_v42 = vpop.permute.xlu0 %617  ;;  %v606_v48 = vpop.permute.xlu1 %605 }
 0x16c   : > { %v630_v43 = vsel %vm625_vm6, %v616_v31, %v618_v42  ;;  %v631_v44 = vsel %vm625_vm6, %v618_v42, %v1740_v57  ;;  %v626_v49 = vsel %vm625_vm6, %v606_v48, %v608_v47  ;;  %v750_v47 = vperm.slane %v742_v36, 0 }
 0x16d   : > { %v642_v45 = vsel %vm378_vm2, %v630_v43, 0  ;;  %v645_v46 = vsel %vm378_vm2, %v631_v44, 0 }
 0x16e   : > { %659 = vmatpush.bf16.msra.mxu0 %v642_v45  ;;  %672 = vmatpush.bf16.msra.mxu1 %v645_v46  ;;  %v745_v45 = vperm.slane %v740_v33, 6 }
 0x172   : > { %660 = vmatpush.bf16.msra.mxu0 %v626_v49  ;;  %673 = vmatpush.bf16.msra.mxu1 %v627_v50  ;;  %v751_v49 = vperm.slane %v743_v38, 0 }
 0x173   : > { %v713_v6 = vpop.permute.xlu0 %712 }
 0x175   : > { %1231 = vmatmul.msk.bf16.vlgmr.msra.gmra.mxu0 %vm435_vm5, %v1230_v41  ;;  %1232 = vmatmul.msk.bf16.vlgmr.msra.gmra.mxu1 %vm435_vm5, %v1230_v41  ;;  %v744_v41 = vperm.slane %v740_v33, 4 }
 0x1cb   : > { %v486_v51 = vpop.f32.mrf.mxu2  ;;  %v499_v52 = vpop.f32.mrf.mxu3 }
 0x1cd   : > { %v460_v53 = vpop.f32.mrf.mxu0  ;;  %v473_v54 = vpop.f32.mrf.mxu1 }
 0x1d3   : > { %v488_v55 = vpop.f32.mrf.mxu2  ;;  %v501_v56 = vpop.f32.mrf.mxu3 }
 0x1d4   : > { %v753_v55 = vperm.slane %v745_v45, 0  ;;  %v1054_v45 = vunpack.c.l.bf16 %v1673_v10 }
 0x1d5   : > { %v462_v57 = vpop.f32.mrf.mxu0  ;;  %v475_v58 = vpop.f32.mrf.mxu1 }
 0x1db   : > { %v586_v59 = vpop.f32.mrf.mxu2  ;;  %v599_v60 = vpop.f32.mrf.mxu3 }
 0x1dc   : > { %v587_v4 = vadd.f32 %v586_v59, %v486_v51  ;;  %v600_v5 = vadd.f32 %v599_v60, %v499_v52  ;;  %v752_v51 = vperm.slane %v744_v41, 0 }
 0x1dd   : > { %v560_v61 = vpop.f32.mrf.mxu0  ;;  %v573_v62 = vpop.f32.mrf.mxu1 }
 0x1de   : > { %v561_v16 = vadd.f32 %v560_v61, %v460_v53  ;;  %v574_v17 = vadd.f32 %v573_v62, %v473_v54 }
 0x1e3   : > { %v588_v63 = vpop.f32.mrf.mxu2  ;;  %v601_v0 = vpop.f32.mrf.mxu3 }
 0x1e5   : > { %v562_v2 = vpop.f32.mrf.mxu0  ;;  %v575_v3 = vpop.f32.mrf.mxu1 }
 0x1eb   : > { %v688_v7 = vpop.f32.mrf.mxu2  ;;  %v701_v8 = vpop.f32.mrf.mxu3 }
 0x1ec   : > { %v707_v9 = vadd.f32 %v688_v7, %v587_v4  ;;  %v708_v11 = vadd.f32 %v701_v8, %v600_v5 }
 0x1ee   : > { %v717_v12 = vadd.f32 %v713_v6, %v707_v9  ;;  %v718_v13 = vadd.f32 %v713_v6, %v708_v11 }
 0x1f0   : > { %v721_v14 = vmul.f32 0.5, %v717_v12  ;;  %v722_v15 = vmul.f32 0.5, %v718_v13 }
 0x1f2   : > { %v662_v18 = vpop.f32.mrf.mxu0  ;;  %v675_v19 = vpop.f32.mrf.mxu1  ;;  %1348 = vtanh.f32 %v721_v14 }
 0x1f3   : > { %v705_v20 = vadd.f32 %v662_v18, %v561_v16  ;;  %v706_v21 = vadd.f32 %v675_v19, %v574_v17  ;;  %v690_v22 = vpop.f32.mrf.mxu2  ;;  %v703_v23 = vpop.f32.mrf.mxu3  ;;  %1350 = vtanh.f32 %v722_v15 }
 0x1f5   : > { %v715_v24 = vadd.f32 %v713_v6, %v705_v20  ;;  %v716_v25 = vadd.f32 %v713_v6, %v706_v21 }
 0x1f7   : > { %v719_v26 = vmul.f32 0.5, %v715_v24  ;;  %v720_v27 = vmul.f32 0.5, %v716_v25 }
 0x1f8   : > { %v1349_v28 = vpop.eup %1348 }
 0x1f9   : > { %1352 = vtanh.f32 %v719_v26  ;;  %v1351_v30 = vpop.eup %1350  ;;  %v729_v34 = vmul.f32 0.5, %v1349_v28 }
 0x1fa   : > { %1354 = vtanh.f32 %v720_v27  ;;  %v664_v31 = vpop.f32.mrf.mxu0  ;;  %v677_v32 = vpop.f32.mrf.mxu1  ;;  %v730_v35 = vmul.f32 0.5, %v1351_v30  ;;  %v1822_v27 = vld [vmem:[#allocation6] sm:$0xf] }
 0x1fb   : > { %v733_v42 = vadd.f32 0.5, %v729_v34 }
 0x1fc   : > { %v734_v43 = vadd.f32 0.5, %v730_v35 }
 0x1fd   : > { %v737_v52 = vmul.f32 %v733_v42, %v717_v12 }
 0x1fe   : > { %v738_v53 = vmul.f32 %v734_v43, %v718_v13  ;;  %v813_v43 = vld [vmem:[#allocation6 + $0x4] sm:$0xf] }
 0x1ff   : > { %v1353_v37 = vpop.eup %1352  ;;  %v756_v59 = vmul.f32 %v752_v51, %v737_v52 }
 0x200   : > { %v1355_v39 = vpop.eup %1354  ;;  %v727_v40 = vmul.f32 0.5, %v1353_v37  ;;  %v757_v60 = vmul.f32 %v753_v55, %v738_v53 }
 0x201   : > { %v728_v44 = vmul.f32 0.5, %v1355_v39 }
 0x202   : > { %v731_v46 = vadd.f32 0.5, %v727_v40  ;;  %v759_v2 = vpack.c.bf16 %v757_v60, %v756_v59 }
 0x203   : > { %v732_v48 = vadd.f32 0.5, %v728_v44 }
 0x204   : > { %v735_v50 = vmul.f32 %v731_v46, %v715_v24  ;;  %v769_v3 = vunpack.c.h.b16 %v759_v2  ;;  %v768_v4 = vunpack.c.l.b16 %v759_v2  ;;  %v1055_v46 = vunpack.c.h.bf16 %v1673_v10 }
 0x205   : > { %v736_v54 = vmul.f32 %v732_v48, %v716_v25  ;;  %v1057_v48 = vunpack.c.h.bf16 %v1662_v1 }
 0x206   : > { %v754_v56 = vmul.f32 %v750_v47, %v735_v50  ;;  %v773_v5 = vpack.c.b16 %v769_v3, %v769_v3  ;;  %v772_v6 = vpack.c.b16 %v768_v4, %v768_v4  ;;  %v1056_v47 = vunpack.c.l.bf16 %v1662_v1 }
 0x207   : > { %v755_v57 = vmul.f32 %v751_v49, %v736_v54  ;;  %v1028_v49 = vld [vmem:[%s1908_s5] sm:$0xff]  ;;  %v1338_v50 = vpack.i.bf16 %v1055_v46, %v1054_v45 }
 0x208   : > { %v1343_v51 = vpack.i.bf16 %v1057_v48, %v1056_v47 }
 0x209   : > { %v758_v58 = vpack.c.bf16 %v755_v57, %v754_v56 }
 0x20b   : > { %v767_v61 = vunpack.c.h.b16 %v758_v58  ;;  %v766_v62 = vunpack.c.l.b16 %v758_v58 }
 0x20d   : > { %v771_v63 = vpack.c.b16 %v767_v61, %v767_v61  ;;  %v770_v0 = vpack.c.b16 %v766_v62, %v766_v62 }
 0x20f   : > { %776 = vrot.lane.b32.xlu0 %v771_v63, %s1514_s28  ;;  %787 = vrot.lane.b32.xlu2 %v771_v63, %s1513_s8 }
 0x210   : > { %785 = vrot.lane.b32.xlu1 %v770_v0, %s1513_s8 }
 0x217   : > { %780 = vrot.lane.b32.xlu0 %v773_v5, %s1514_s28  ;;  %774 = vrot.lane.b32.xlu2 %v770_v0, %s1514_s28 }
 0x218   : > { %789 = vrot.lane.b32.xlu1 %v772_v6, %s1513_s8 }
 0x21f   : > { %791 = vrot.lane.b32.xlu2 %v773_v5, %s1513_s8  ;;  %s1520_s8 = smov 92  }
 0x220   : > { %778 = vrot.lane.b32.xlu1 %v772_v6, %s1514_s28  ;;  %s1442_s28 = scalar_lea.hbm %s1909_s6, 24 }
 0x221   : > { %p1444_p11 = scmp.lt.s32.totalorder %s1442_s28, %s1438_s10 }
 0x223   : > { %p1445_p12 = por %p1444_p11, %p1443_p10 }
 0x225   : > { %p1446_p13 = pnand %p1445_p12, %p1441_p8 }
 0x269   : > { %v788_v7 = vpop.permute.xlu2 %787 }
 0x271   : > { %v775_v8 = vpop.permute.xlu2 %774 }
 0x279   : > { %v792_v17 = vpop.permute.xlu2 %791 }
 0x281   : > { %v777_v9 = vpop.permute.xlu0 %776 }
 0x282   : > { %v782_v11 = vsel %vm354_vm1, %v775_v8, %v777_v9  ;;  %v786_v12 = vpop.permute.xlu1 %785 }
 0x283   : > { %v793_v13 = vsel %vm372_vm0, %v786_v12, %v788_v7  ;;  %v798_v14 = vsel %vm378_vm2, %v770_v0, %v782_v11 }
 0x284   : > { %826 = vrot.lane.b32.xlu1 %v793_v13, %s1519_s14  ;;  %818 = vrot.lane.b32.xlu0 %v798_v14, %s1519_s14  ;;  %v899_v15 = vsel %vm378_vm2, %v793_v13, 0 }
 0x285   : > { %913 = vmatpush.bf16.msrb.mxu3 %v899_v15 }
 0x289   : > { %914 = vmatpush.bf16.msrb.mxu3 %v798_v14  ;;  %v781_v23 = vpop.permute.xlu0 %780 }
 0x28a   : > { %v790_v16 = vpop.permute.xlu1 %789  ;;  %v810_v25 = vsel %vm378_vm2, %v773_v5, %v781_v23  ;;  %v947_v5 = vld [vmem:[#allocation6 + $0x8] sm:$0xf] }
 0x28b   : > { %v794_v18 = vsel %vm372_vm0, %v788_v7, %v790_v16  ;;  %v1814_v21 = vsel %vm372_vm0, %v790_v16, %v792_v17 }
 0x28c   : > { %828 = vrot.lane.b32.xlu2 %v794_v18, %s1519_s14  ;;  %832 = vrot.lane.b32.xlu0 %v792_v17, %s1519_s14  ;;  %v902_v42 = vsel %vm378_vm2, %v794_v18, 0  ;;  %v905_v1 = vsel %vm378_vm2, %v1814_v21, 0 }
 0x28d   : > { %1238 = vmatmul.msk.bf16.vlgmr.msrb.gmra.mxu3 %vm435_vm5, %v1822_v27 }
 0x292   : > { %v779_v19 = vpop.permute.xlu1 %778 }
 0x293   : > { %v783_v20 = vsel %vm354_vm1, %v777_v9, %v779_v19  ;;  %v784_v24 = vsel %vm354_vm1, %v779_v19, %v781_v23 }
 0x294   : > { %830 = vrot.lane.b32.xlu2 %v1814_v21, %s1519_s14  ;;  %956 = vrot.lane.b32.xlu0 %v793_v13, %s1520_s8  ;;  %v802_v22 = vsel %vm378_vm2, %v771_v63, %v783_v20  ;;  %v806_v26 = vsel %vm378_vm2, %v772_v6, %v784_v24 }
 0x295   : > { %820 = vrot.lane.b32.xlu1 %v802_v22, %s1519_s14 }
 0x29c   : > { %824 = vrot.lane.b32.xlu2 %v810_v25, %s1519_s14  ;;  %948 = vrot.lane.b32.xlu0 %v798_v14, %s1520_s8 }
 0x29d   : > { %822 = vrot.lane.b32.xlu1 %v806_v26, %s1519_s14 }
 0x2a4   : > { %960 = vrot.lane.b32.xlu2 %v1814_v21, %s1520_s8  ;;  %962 = vrot.lane.b32.xlu0 %v792_v17, %s1520_s8 }
 0x2a5   : > { %958 = vrot.lane.b32.xlu1 %v794_v18, %s1520_s8 }
 0x2ac   : > { %952 = vrot.lane.b32.xlu2 %v806_v26, %s1520_s8  ;;  %1339 = vrot.lane.b32.xlu0 %v1338_v50, %s1521_s30 }
 0x2ad   : > { %950 = vrot.lane.b32.xlu1 %v802_v22, %s1520_s8 }
 0x2b4   : > { %1031 = vperm.xlu2 %1337, %v1028_v49  }
 0x2b5   : > { %954 = vrot.lane.b32.xlu1 %v810_v25, %s1520_s8 }
 0x2bd   : > { %1344 = vrot.lane.b32.xlu1 %v1343_v51, %s1521_s30 }
 0x2e6   : > { %v829_v28 = vpop.permute.xlu2 %828 }
 0x2ee   : > { %v831_v29 = vpop.permute.xlu2 %830 }
 0x2ef   : > { %v839_v30 = vsel %vm834_vm7, %v829_v28, %v831_v29 }
 0x2f0   : > { %v851_v31 = vsel %vm378_vm2, %v839_v30, 0 }
 0x2f1   : > { %875 = vmatpush.bf16.msrb.mxu1 %v851_v31 }
 0x2f6   : > { %v827_v32 = vpop.permute.xlu1 %826  ;;  %v819_v34 = vpop.permute.xlu0 %818 }
 0x2f7   : > { %v838_v33 = vsel %vm834_vm7, %v827_v32, %v829_v28  ;;  %v825_v44 = vpop.permute.xlu2 %824 }
 0x2f8   : > { %v848_v35 = vsel %vm378_vm2, %v838_v33, 0 }
 0x2f9   : > { %862 = vmatpush.bf16.msrb.mxu0 %v848_v35 }
 0x2fe   : > { %v833_v36 = vpop.permute.xlu0 %832 }
 0x2ff   : > { %v840_v37 = vsel %vm834_vm7, %v831_v29, %v833_v36  ;;  %v961_v10 = vpop.permute.xlu2 %960 }
 0x300   : > { %v854_v38 = vsel %vm378_vm2, %v840_v37, 0 }
 0x301   : > { %888 = vmatpush.bf16.msrb.mxu2 %v854_v38 }
 0x306   : > { %v957_v39 = vpop.permute.xlu0 %956 }
 0x307   : > { %v821_v40 = vpop.permute.xlu1 %820  ;;  %v953_v0 = vpop.permute.xlu2 %952 }
 0x308   : > { %v835_v41 = vsel %vm834_vm7, %v819_v34, %v821_v40 }
 0x309   : > { %863 = vmatpush.bf16.msrb.mxu0 %v835_v41 }
 0x30c   : > { %1235 = vmatmul.msk.bf16.vlgmr.msrb.gmra.mxu0 %vm435_vm5, %v813_v43 }
 0x30d   : > { %926 = vmatpush.bf16.msra.mxu0 %v902_v42 }
 0x30e   : > { %v949_v52 = vpop.permute.xlu0 %948 }
 0x30f   : > { %v823_v53 = vpop.permute.xlu1 %822 }
 0x310   : > { %v836_v54 = vsel %vm834_vm7, %v821_v40, %v823_v53  ;;  %v837_v55 = vsel %vm834_vm7, %v823_v53, %v825_v44  ;;  %v916_v8 = vpop.f32.mrf.mxu3 }
 0x311   : > { %927 = vmatpush.bf16.msra.mxu0 %v802_v22  ;;  %876 = vmatpush.bf16.msrb.mxu1 %v836_v54  ;;  %v1032_v22 = vpop.permute.xlu2 %1031 }
 0x312   : > { %889 = vmatpush.bf16.msrb.mxu2 %v837_v55 }
 0x314   : > { %1236 = vmatmul.msk.bf16.vlgmr.msrb.gmra.mxu1 %vm435_vm5, %v813_v43 }
 0x315   : > { %939 = vmatpush.bf16.msra.mxu1 %v905_v1  ;;  %1237 = vmatmul.msk.bf16.vlgmr.msrb.gmra.mxu2 %vm435_vm5, %v813_v43 }
 0x316   : > { %v963_v56 = vpop.permute.xlu0 %962 }
 0x317   : > { %v959_v57 = vpop.permute.xlu1 %958  ;;  %v970_v58 = vsel %vm964_vm8, %v961_v10, %v963_v56 }
 0x318   : > { %v968_v59 = vsel %vm964_vm8, %v957_v39, %v959_v57  ;;  %v969_v60 = vsel %vm964_vm8, %v959_v57, %v961_v10  ;;  %v984_v61 = vsel %vm378_vm2, %v970_v58, 0  ;;  %v918_v9 = vpop.f32.mrf.mxu3 }
 0x319   : > { %940 = vmatpush.bf16.msra.mxu1 %v806_v26  ;;  %v978_v62 = vsel %vm378_vm2, %v968_v59, 0  ;;  %v981_v63 = vsel %vm378_vm2, %v969_v60, 0  ;;  %1018 = vmatpush.bf16.msrb.mxu0 %v984_v61 }
 0x31a   : > { %992 = vmatpush.bf16.msra.mxu2 %v978_v62  ;;  %1005 = vmatpush.bf16.msra.mxu3 %v981_v63 }
 0x31c   : > { %1239 = vmatmul.msk.bf16.vlgmr.msra.gmra.mxu0 %vm435_vm5, %v1822_v27 }
 0x31e   : > { %v1340_v40 = vpop.permute.xlu0 %1339 }
 0x31f   : > { %v951_v2 = vpop.permute.xlu1 %950  ;;  %v1342_v43 = vunpack.i.h.bf16 %v1340_v40  ;;  %v1341_v44 = vunpack.i.l.bf16 %v1340_v40 }
 0x320   : > { %v965_v3 = vsel %vm964_vm8, %v949_v52, %v951_v2  ;;  %v966_v4 = vsel %vm964_vm8, %v951_v2, %v953_v0 }
 0x321   : > { %993 = vmatpush.bf16.msra.mxu2 %v965_v3  ;;  %1006 = vmatpush.bf16.msra.mxu3 %v966_v4  ;;  %v1071_v54 = vsel %vm1070_vm9, %v1341_v44, %v1342_v43 }
 0x324   : > { %1242 = vmatmul.msk.bf16.vlgmr.msra.gmra.mxu3 %vm435_vm5, %v947_v5  ;;  %1240 = vmatmul.msk.bf16.vlgmr.msra.gmra.mxu1 %vm435_vm5, %v1822_v27 }
 0x325   : > { %1241 = vmatmul.msk.bf16.vlgmr.msra.gmra.mxu2 %vm435_vm5, %v947_v5 }
 0x327   : > { %v955_v6 = vpop.permute.xlu1 %954 }
 0x328   : > { %v967_v7 = vsel %vm964_vm8, %v953_v0, %v955_v6 }
 0x329   : > { %1019 = vmatpush.bf16.msrb.mxu0 %v967_v7 }
 0x32c   : > { %1243 = vmatmul.msk.bf16.vlgmr.msrb.gmra.mxu0 %vm435_vm5, %v947_v5 }
 0x32f   : > { %v1345_v41 = vpop.permute.xlu1 %1344 }
 0x330   : > { %v1346_v47 = vunpack.i.l.bf16 %v1345_v41  ;;  %v1347_v50 = vunpack.i.h.bf16 %v1345_v41 }
 0x332   : > { %v1072_v10 = vsel %vm1070_vm9, %v1342_v43, %v1346_v47  ;;  %v1073_v57 = vsel %vm1070_vm9, %v1346_v47, %v1347_v50 }
 0x389   : > { %v865_v11 = vpop.f32.mrf.mxu0 }
 0x38a   : > { %v917_v20 = vadd.f32 %v916_v8, %v865_v11 }
 0x391   : > { %v867_v12 = vpop.f32.mrf.mxu0  ;;  %v878_v13 = vpop.f32.mrf.mxu1 }
 0x398   : > { %v891_v14 = vpop.f32.mrf.mxu2 }
 0x399   : > { %v929_v15 = vpop.f32.mrf.mxu0  ;;  %v880_v16 = vpop.f32.mrf.mxu1 }
 0x39a   : > { %v930_v21 = vadd.f32 %v929_v15, %v878_v13 }
 0x3a0   : > { %v893_v17 = vpop.f32.mrf.mxu2 }
 0x3a1   : > { %v931_v18 = vpop.f32.mrf.mxu0  ;;  %v942_v19 = vpop.f32.mrf.mxu1 }
 0x3a2   : > { %v943_v25 = vadd.f32 %v942_v19, %v891_v14 }
 0x3a7   : > { %v1008_v24 = vpop.f32.mrf.mxu3 }
 0x3a8   : > { %v995_v23 = vpop.f32.mrf.mxu2  ;;  %v1026_v27 = vadd.f32 %v1008_v24, %v930_v21 }
 0x3a9   : > { %v1025_v26 = vadd.f32 %v995_v23, %v917_v20  ;;  %v1021_v28 = vpop.f32.mrf.mxu0  ;;  %v944_v32 = vpop.f32.mrf.mxu1 }
 0x3aa   : > { %v1035_v30 = vadd.f32 %v1032_v22, %v1026_v27  ;;  %v1027_v31 = vadd.f32 %v1021_v28, %v943_v25 }
 0x3ab   : > { %v1034_v29 = vadd.f32 %v1032_v22, %v1025_v26 }
 0x3ac   : > { %v1038_v34 = vmul.f32 0.5, %v1035_v30  ;;  %v1036_v35 = vadd.f32 %v1032_v22, %v1027_v31 }
 0x3ad   : > { %v1037_v33 = vmul.f32 0.5, %v1034_v29 }
 0x3ae   : > { %v1039_v36 = vmul.f32 0.5, %v1036_v35 }
 0x3af   : > { %1356 = vtanh.f32 %v1037_v33  ;;  %v1010_v38 = vpop.f32.mrf.mxu3 }
 0x3b0   : > { %1358 = vtanh.f32 %v1038_v34  ;;  %v997_v37 = vpop.f32.mrf.mxu2 }
 0x3b1   : > { %1360 = vtanh.f32 %v1039_v36  ;;  %v1023_v39 = vpop.f32.mrf.mxu0 }
 0x3b5   : > { %v1357_v42 = vpop.eup %1356 }
 0x3b6   : > { %v1359_v45 = vpop.eup %1358  ;;  %v1043_v46 = vmul.f32 0.5, %v1357_v42 }
 0x3b7   : > { %v1361_v48 = vpop.eup %1360  ;;  %v1044_v49 = vmul.f32 0.5, %v1359_v45 }
 0x3b8   : > { %v1046_v51 = vadd.f32 0.5, %v1043_v46  ;;  %v1045_v52 = vmul.f32 0.5, %v1361_v48 }
 0x3b9   : > { %v1047_v53 = vadd.f32 0.5, %v1044_v49 }
 0x3ba   : > { %v1049_v55 = vmul.f32 %v1046_v51, %v1034_v29  ;;  %v1048_v1 = vadd.f32 0.5, %v1045_v52 }
 0x3bb   : > { %v1050_v56 = vmul.f32 %v1047_v53, %v1035_v30 }
 0x3bc   : > { %v1051_v58 = vmul.f32 %v1048_v1, %v1036_v35  ;;  %v1077_v59 = vadd.f32 %v1071_v54, %v1049_v55 }
 0x3bd   : > { %v1078_v60 = vadd.f32 %v1072_v10, %v1050_v56 }
 0x3be   : > { %v1079_v61 = vadd.f32 %v1073_v57, %v1051_v58 }
 0x3bf   : > { %v1080_v62 = vpack.c.bf16 %v1078_v60, %v1077_v59 }
 0x3c0   : > { %v1081_v63 = vpack.c.bf16 %v1079_v61, %v1079_v61 }
 0x3c1   : > { %1082 = vst [vmem:[%s317_s24] sm:$0xff] %v1080_v62 }
 0x3c2   : > { %1083 = vst [vmem:[%s317_s24 + $0x8] sm:$0xf] %v1081_v63 }
 0x3c3   : > { %1449 = shalt.err (!%p1446_p13)
}
 0x3c4   : > { %1258 = dma.vmem_to_hbm [thread:$0]  (%p1628_p4), %s1101_s13, 192, %s1103_s18, %s1085_s15  }
 0x3c5 PF: > { %s1114_s4 = sand.u32 1, %s1488_s21   ;;  %p1269_p0 = pnand %p1217_p6, %p1636_p7 }
 0x3c6   : > { %s1115_s7 = scalar_lea.sflag [#allocation5], %s1114_s4 }
 0x3c7   : > { %p1270_p2 = pneg %p1269_p0 }
 0x3c9   : > { %1483 = dma.done.wait (%p1270_p2), %s1115_s7, 192  }
 0x3ca   : > { %1485 = vsyncadd (%p1270_p2), %s1115_s7, 4294967104  ;;  %s23_s26 = sadd.s32 1, %s1508_s26   ;;  %s1920_s19 = sld [smem:[#allocation12_spill]] }
 0x3cb   : > { %p20_p5 = scmp.ge.s32.totalorder %s23_s26, 4   ;;  %s1921_s21 = smov %s1492_s22 }
 0x3cc   : > { %s1922_s22 = smov %s1496_s23  ;;  %s1923_s23 = smov %s1634_s20 }
 0x3cd   : > { %s1924_s24 = smov %s1504_s25  ;;  %22 = sbr.rel (!%p20_p5) target bundleno = 9 (0x9), region = 100 }
 0x3d0   : > { %s1925_s25 = smov %s1920_s19 }
 0x3d2   :  { %1121 = vsyncpa [#allocation4], 1 }
 0x3d3   :  { %1123 = vsyncpa [#allocation4 + $0x1], 1 }
 0x3d4   :  { %1124 = vsyncpa [#allocation7], 1 }
 0x3d5   :  { %1125 = vsyncpa [#allocation5], 1 }
 0x3d6   :  { %1127 = vsyncpa [#allocation5 + $0x1], 1 }

</bundles_post_ra>
